<compile_context>
chip_gen: v7x
topology: tpu7x:2x2x1
jax: 0.10.0
libtpu: 0.0.40
codegen_flags: <defaults>
</compile_context>

<pallas_src>
import functools
import math

import numpy as np
import jax
import jax.numpy as jnp
from jax import lax
from jax.experimental import pallas as pl
from jax.experimental.pallas import tpu as pltpu


# ----------------------------------------------------------------------------
# Pallas kernel: conv1(k7,p3)+ReLU+maxpool2 -> conv2(k3,p1)+ReLU+maxpool2
#                -> conv3(k3,p1)+ReLU+maxpool2 -> avgpool -> MLP(dim->dim->ncls)
# One grid step processes one batch tile of `bt` sequences, flattened to rows.
# ----------------------------------------------------------------------------
def _cnn_kernel(x_ref, w1_ref, b1_ref, w2_ref, b2_ref, w3_ref, b3_ref,
                wm1_ref, bm1_ref, wm2_ref, bm2_ref, out_ref, pool_ref,
                *, bt, L, dim, compute_dtype):
    f32 = jnp.float32
    L1, L2, L3 = L // 2, L // 4, L // 8

    def mm(a, b):
        return jnp.dot(a.astype(compute_dtype), b.astype(compute_dtype),
                       preferred_element_type=f32)

    def shift_up(h):    # out[t] = h[t + 1]; last row -> 0
        zero = jnp.zeros((1, h.shape[1]), h.dtype)
        return jnp.concatenate([h[1:, :], zero], axis=0)

    def shift_down(h):  # out[t] = h[t - 1]; first row -> 0
        zero = jnp.zeros((1, h.shape[1]), h.dtype)
        return jnp.concatenate([zero, h[:-1, :]], axis=0)

    def maxpool2(h):
        # Rows are batch-major with an even per-batch length (L % 8 == 0), so
        # the row pairs (2u, 2u+1) never straddle a batch boundary.
        n = h.shape[0]
        pool_ref[pl.ds(0, n), :] = h                        # one dense store
        even = pool_ref[pl.ds(0, n // 2, stride=2), :]
        odd = pool_ref[pl.ds(1, n // 2, stride=2), :]
        return jnp.maximum(even, odd)                       # (n // 2, dim)

    def conv3_relu(p, w_ref, b_ref, per_batch_len):
        # kernel_size=3, padding=1 conv over batch-flattened rows `p`.
        n = p.shape[0]
        row = lax.broadcasted_iota(jnp.int32, (n, 1), 0)
        local = row % per_batch_len
        p_prev = jnp.where(local != 0, shift_down(p), 0.0)
        p_next = jnp.where(local != per_batch_len - 1, shift_up(p), 0.0)
        acc = mm(p_prev, w_ref[0]) + mm(p, w_ref[1]) + mm(p_next, w_ref[2])
        return jnp.maximum(acc + b_ref[...], 0.0)

    # conv1 (im2col'd in the wrapper) + ReLU + maxpool ------------------------
    x = x_ref[0]                                            # (bt*L, 7*d_inp)
    h = jnp.maximum(mm(x, w1_ref[...]) + b1_ref[...], 0.0)  # (bt*L,  dim)
    h = maxpool2(h)                                         # (bt*L1, dim)

    # conv2 + ReLU + maxpool ---------------------------------------------------
    h = conv3_relu(h, w2_ref, b2_ref, L1)
    h = maxpool2(h)                                         # (bt*L2, dim)

    # conv3 + ReLU + maxpool ---------------------------------------------------
    h = conv3_relu(h, w3_ref, b3_ref, L2)
    h = maxpool2(h)                                         # (bt*L3, dim)

    # AdaptiveAvgPool1d(1): per-batch mean over the remaining L3 rows,
    # expressed as one (bt, bt*L3) averaging-matrix matmul.
    r = lax.broadcasted_iota(jnp.int32, (bt, bt * L3), 0)
    c = lax.broadcasted_iota(jnp.int32, (bt, bt * L3), 1)
    avg = jnp.where((c >= r * L3) & (c < (r + 1) * L3), 1.0 / L3, 0.0)
    emb = jnp.dot(avg, h, preferred_element_type=f32)       # (bt, dim)

    # MLP: Linear -> ReLU -> Linear (n_classes padded to 128 lanes) ------------
    z = jnp.maximum(mm(emb, wm1_ref[...]) + bm1_ref[...], 0.0)
    out_ref[0] = mm(z, wm2_ref[...]) + bm2_ref[...]         # single dense store


# ----------------------------------------------------------------------------
# Wrapper: PyTorch-style layout handling (permute(1,2,0), pad T<8, im2col,
# weight re-layout) + pallas_call with a batch-tile grid.
# Mirrors CNN.forward with captum_input=False, get_embedding=False.
# ----------------------------------------------------------------------------
def cnn_forward(x, _times, params, *, dim, n_classes,
                batch_tile=None, use_bf16=False):
    f32 = jnp.float32
    if x.ndim == 2:                                      # (T, d) -> (T, 1, d)
        x = x[:, None, :]
    xb = jnp.transpose(x, (1, 2, 0)).astype(f32)         # (B, d_inp, T)
    B, d_inp, T = xb.shape
    if T < 8:                                            # F.pad(..., (0, 8-T))
        xb = jnp.pad(xb, ((0, 0), (0, 0), (0, 8 - T)))
        T = 8
    L = T
    if L % 8 != 0:
        # TODO(synk): support (padded) sequence lengths that are not multiples
        # of 8 (odd pooled lengths make flattened row pairs straddle batches).
        raise NotImplementedError("cnn_forward requires the padded sequence "
                                  "length to be a multiple of 8")
    L1, L2, L3 = L // 2, L // 4, L // 8

    if batch_tile is None:
        # Target ~1024 flattened rows per grid step (good MXU/DMA granularity)
        # while keeping >= 2 grid steps when B > 1 so the "parallel" batch
        # axis can shard across v7x's two TensorCores.
        rows_target = max(1, 1024 // L)
        batch_tile = max(1, min(rows_target, pl.cdiv(B, 2) if B > 1 else 1))
        batch_tile = min(batch_tile, B)
    bt = batch_tile
    num_tiles = pl.cdiv(B, bt)
    b_pad = num_tiles * bt

    # NLC layout, conv1 halo (padding=3), im2col, flatten batch tile x L rows.
    x_nlc = jnp.transpose(xb, (0, 2, 1))                 # (B, L, d_inp)
    if b_pad != B:
        x_nlc = jnp.pad(x_nlc, ((0, b_pad - B), (0, 0), (0, 0)))
    x_halo = jnp.pad(x_nlc, ((0, 0), (3, 3), (0, 0)))    # (Bpad, L+6, d_inp)
    x_im2col = jnp.concatenate([x_halo[:, k:k + L, :] for k in range(7)],
                               axis=-1)                  # (Bpad, L, 7*d_inp)
    x_in = x_im2col.reshape(num_tiles, bt * L, 7 * d_inp)

    # Kernel-friendly parameter layouts (tap-major, out-channel last).
    w1 = jnp.transpose(params["W1"], (2, 1, 0)).astype(f32).reshape(7 * d_inp, dim)
    w2 = jnp.transpose(params["W2"], (2, 1, 0)).astype(f32)   # (3, dim, dim)
    w3 = jnp.transpose(params["W3"], (2, 1, 0)).astype(f32)   # (3, dim, dim)
    b1 = params["b1"].reshape(1, dim).astype(f32)
    b2 = params["b2"].reshape(1, dim).astype(f32)
    b3 = params["b3"].reshape(1, dim).astype(f32)
    wm1 = params["Wm1"].T.astype(f32)                         # (dim, dim)
    bm1 = params["bm1"].reshape(1, dim).astype(f32)
    ncp = ((n_classes + 127) // 128) * 128               # lane-dense logits
    wm2 = jnp.zeros((dim, ncp), f32).at[:, :n_classes].set(params["Wm2"].T)
    bm2 = jnp.zeros((1, ncp), f32).at[:, :n_classes].set(
        params["bm2"].reshape(1, n_classes))

    def full_spec(shape):
        zeros = (0,) * len(shape)
        return pl.BlockSpec(shape, lambda i: zeros)

    kernel = functools.partial(
        _cnn_kernel, bt=bt, L=L, dim=dim,
        compute_dtype=jnp.bfloat16 if use_bf16 else f32)

    out = pl.pallas_call(
        kernel,
        grid=(num_tiles,),
        out_shape=jax.ShapeDtypeStruct((num_tiles, bt, ncp), f32),
        in_specs=[
            pl.BlockSpec((1, bt * L, 7 * d_inp), lambda i: (i, 0, 0)),
            full_spec(w1.shape), full_spec(b1.shape),
            full_spec(w2.shape), full_spec(b2.shape),
            full_spec(w3.shape), full_spec(b3.shape),
            full_spec(wm1.shape), full_spec(bm1.shape),
            full_spec(wm2.shape), full_spec(bm2.shape),
        ],
        out_specs=pl.BlockSpec((1, bt, ncp), lambda i: (i, 0, 0)),
        scratch_shapes=[pltpu.VMEM((bt * L, dim), f32)],   # pooling staging buf
        compiler_params=pltpu.CompilerParams(
            dimension_semantics=("parallel",),
            vmem_limit_bytes=32 * 1024 * 1024),
    )(x_in, w1, b1, w2, b2, w3, b3, wm1, bm1, wm2, bm2)

    return out.reshape(b_pad, ncp)[:B, :n_classes]


# ----------------------------------------------------------------------------
# Plain-JAX reference (independent of the kernel) for validation.
# ----------------------------------------------------------------------------
def cnn_reference(x, params):
    if x.ndim == 2:
        x = x[:, None, :]
    h = jnp.transpose(x, (1, 2, 0)).astype(jnp.float32)      # (B, C, L)
    if h.shape[-1] < 8:
        h = jnp.pad(h, ((0, 0), (0, 0), (0, 8 - h.shape[-1])))

    def conv(h, w, b, pad):
        y = lax.conv_general_dilated(h, w, window_strides=(1,),
                                     padding=[(pad, pad)],
                                     dimension_numbers=("NCH", "OIH", "NCH"))
        return y + b[None, :, None]

    def maxpool(h):
        Bc, C, Lc = h.shape
        return h[:, :, :(Lc // 2) * 2].reshape(Bc, C, Lc // 2, 2).max(axis=-1)

    h = maxpool(jax.nn.relu(conv(h, params["W1"], params["b1"], 3)))
    h = maxpool(jax.nn.relu(conv(h, params["W2"], params["b2"], 1)))
    h = maxpool(jax.nn.relu(conv(h, params["W3"], params["b3"], 1)))
    emb = h.mean(axis=-1)                                    # AdaptiveAvgPool1d(1)
    z = jax.nn.relu(emb @ params["Wm1"].T + params["bm1"])
    return z @ params["Wm2"].T + params["bm2"]


# ----------------------------------------------------------------------------
# Deterministic parameter init (torch layouts; uniform +/- 1/sqrt(fan_in)).
# ----------------------------------------------------------------------------
def init_params(key, d_inp, dim, n_classes):
    ks = jax.random.split(key, 10)

    def u(k, shape, fan_in):
        b = 1.0 / math.sqrt(fan_in)
        return jax.random.uniform(k, shape, jnp.float32, -b, b)

    return {
        "W1": u(ks[0], (dim, d_inp, 7), d_inp * 7), "b1": u(ks[1], (dim,), d_inp * 7),
        "W2": u(ks[2], (dim, dim, 3), dim * 3),     "b2": u(ks[3], (dim,), dim * 3),
        "W3": u(ks[4], (dim, dim, 3), dim * 3),     "b3": u(ks[5], (dim,), dim * 3),
        "Wm1": u(ks[6], (dim, dim), dim),           "bm1": u(ks[7], (dim,), dim),
        "Wm2": u(ks[8], (n_classes, dim), dim),     "bm2": u(ks[9], (n_classes,), dim),
    }


if __name__ == "__main__":
    d_inp, dim, n_classes = 4, 32, 5
    T, B = 16, 3                       # B=3 with batch_tile=2 exercises the
                                       # multi-tile grid and the batch padding

    key = jax.random.PRNGKey(0)
    kx, kp = jax.random.split(key)
    x = jax.random.normal(kx, (T, B, d_inp), jnp.float32)    # (time, batch, feat)
    times = jnp.broadcast_to(jnp.arange(T, dtype=jnp.float32)[:, None], (T, B))
    params = init_params(kp, d_inp, dim, n_classes)

    out = cnn_forward(x, times, params, dim=dim, n_classes=n_classes,
                      batch_tile=2)
    out = jax.block_until_ready(out)

    ref = cnn_reference(x, params)
    assert out.shape == (B, n_classes)
    np.testing.assert_allclose(np.asarray(out), np.asarray(ref),
                               rtol=2e-3, atol=2e-3)
    print("KERNEL_OK")
</pallas_src>

<mosaic_0001>
module attributes {stable_mosaic.version = 11 : i64} {
  func.func @_cnn_kernel(%arg0: i32, %arg1: memref<1x32x28xf32, #tpu.memory_space<vmem>>, %arg2: memref<28x32xf32, #tpu.memory_space<vmem>>, %arg3: memref<1x32xf32, #tpu.memory_space<vmem>>, %arg4: memref<3x32x32xf32, #tpu.memory_space<vmem>>, %arg5: memref<1x32xf32, #tpu.memory_space<vmem>>, %arg6: memref<3x32x32xf32, #tpu.memory_space<vmem>>, %arg7: memref<1x32xf32, #tpu.memory_space<vmem>>, %arg8: memref<32x32xf32, #tpu.memory_space<vmem>>, %arg9: memref<1x32xf32, #tpu.memory_space<vmem>>, %arg10: memref<32x128xf32, #tpu.memory_space<vmem>>, %arg11: memref<1x128xf32, #tpu.memory_space<vmem>>, %arg12: memref<1x2x128xf32, #tpu.memory_space<vmem>>, %arg13: memref<32x32xf32, #tpu.memory_space<vmem>>) attributes {dimension_semantics = [#tpu.dimension_semantics<parallel>], iteration_bounds = array<i64: 2>, scalar_prefetch = 0 : i64, scratch_operands = 1 : i64, tpu.core_type = #tpu.core_type<tc>, window_params = [{transform_indices = @transform_0, window_bounds = array<i64: 1, 32, 28>}, {pipeline_mode = #tpu.pipeline_mode<synchronous>, transform_indices = @transform_1, window_bounds = array<i64: 28, 32>}, {pipeline_mode = #tpu.pipeline_mode<synchronous>, transform_indices = @transform_2, window_bounds = array<i64: 1, 32>}, {pipeline_mode = #tpu.pipeline_mode<synchronous>, transform_indices = @transform_3, window_bounds = array<i64: 3, 32, 32>}, {pipeline_mode = #tpu.pipeline_mode<synchronous>, transform_indices = @transform_4, window_bounds = array<i64: 1, 32>}, {pipeline_mode = #tpu.pipeline_mode<synchronous>, transform_indices = @transform_5, window_bounds = array<i64: 3, 32, 32>}, {pipeline_mode = #tpu.pipeline_mode<synchronous>, transform_indices = @transform_6, window_bounds = array<i64: 1, 32>}, {pipeline_mode = #tpu.pipeline_mode<synchronous>, transform_indices = @transform_7, window_bounds = array<i64: 32, 32>}, {pipeline_mode = #tpu.pipeline_mode<synchronous>, transform_indices = @transform_8, window_bounds = array<i64: 1, 32>}, {pipeline_mode = #tpu.pipeline_mode<synchronous>, transform_indices = @transform_9, window_bounds = array<i64: 32, 128>}, {pipeline_mode = #tpu.pipeline_mode<synchronous>, transform_indices = @transform_10, window_bounds = array<i64: 1, 128>}, {transform_indices = @transform_11, window_bounds = array<i64: 1, 2, 128>}]} {
    %c0 = arith.constant 0 : index
    %c0_0 = arith.constant 0 : index
    %c0_1 = arith.constant 0 : index
    %0 = vector.load %arg1[%c0, %c0_0, %c0_1] : memref<1x32x28xf32, #tpu.memory_space<vmem>>, vector<1x32x28xf32>
    %1 = vector.shape_cast %0 : vector<1x32x28xf32> to vector<32x28xf32>
    %c0_2 = arith.constant 0 : index
    %c0_3 = arith.constant 0 : index
    %2 = vector.load %arg2[%c0_2, %c0_3] : memref<28x32xf32, #tpu.memory_space<vmem>>, vector<28x32xf32>
    %cst = arith.constant dense<0.000000e+00> : vector<32x32xf32>
    %3 = tpu.matmul %1, %2, %cst {dimension_numbers = #tpu.dot_dimension_numbers<[1], [0], [0], [1], [0, 0, 1, 1], [], []>} : vector<32x28xf32>, vector<28x32xf32>, vector<32x32xf32> -> vector<32x32xf32>
    %c0_4 = arith.constant 0 : index
    %c0_5 = arith.constant 0 : index
    %4 = vector.load %arg3[%c0_4, %c0_5] : memref<1x32xf32, #tpu.memory_space<vmem>>, vector<1x32xf32>
    %5 = vector.broadcast %4 : vector<1x32xf32> to vector<32x32xf32>
    %6 = arith.addf %3, %5 : vector<32x32xf32>
    %cst_6 = arith.constant 0.000000e+00 : f32
    %7 = vector.broadcast %cst_6 : f32 to vector<32x32xf32>
    %8 = arith.maximumf %6, %7 : vector<32x32xf32>
    %c0_7 = arith.constant 0 : index
    %c0_8 = arith.constant 0 : index
    %9 = vector.load %arg13[%c0_7, %c0_8] : memref<32x32xf32, #tpu.memory_space<vmem>>, vector<32x32xf32>
    tpu.vector_store %arg13[%c0_7, %c0_8], %8 {strides = array<i32>} : memref<32x32xf32, #tpu.memory_space<vmem>>, vector<32x32xf32>,
    %c0_9 = arith.constant 0 : index
    %c0_10 = arith.constant 0 : index
    %10 = tpu.strided_load %arg13[%c0_9, %c0_10] {strides = array<i32: 2, 1>} : memref<32x32xf32, #tpu.memory_space<vmem>>, vector<16x32xf32>
    %c1 = arith.constant 1 : index
    %c0_11 = arith.constant 0 : index
    %11 = tpu.strided_load %arg13[%c1, %c0_11] {strides = array<i32: 2, 1>} : memref<32x32xf32, #tpu.memory_space<vmem>>, vector<16x32xf32>
    %12 = arith.maximumf %10, %11 : vector<16x32xf32>
    %13 = tpu.iota {dimensions = array<i32: 0>} : vector<16x1xi32>
    %c8_i32 = arith.constant 8 : i32
    %c0_i32 = arith.constant 0 : i32
    %14 = arith.cmpi eq, %c8_i32, %c0_i32 : i32
    %c1_i32 = arith.constant 1 : i32
    %15 = arith.select %14, %c1_i32, %c8_i32 : i32
    %16 = vector.broadcast %15 : i32 to vector<16x1xi32>
    %17 = arith.remsi %13, %16 : vector<16x1xi32>
    %c0_i32_12 = arith.constant 0 : i32
    %18 = vector.broadcast %c0_i32_12 : i32 to vector<16x1xi32>
    %19 = arith.cmpi ne, %17, %18 : vector<16x1xi32>
    %c0_i32_13 = arith.constant 0 : i32
    %20 = vector.broadcast %c0_i32_13 : i32 to vector<16x1xi32>
    %21 = arith.cmpi slt, %17, %20 : vector<16x1xi32>
    %c0_i32_14 = arith.constant 0 : i32
    %22 = arith.cmpi slt, %15, %c0_i32_14 : i32
    %23 = vector.broadcast %22 : i1 to vector<16x1xi1>
    %24 = vector.broadcast %23 : vector<16x1xi1> to vector<16x1xi1>
    %25 = arith.xori %21, %24 : vector<16x1xi1>
    %26 = arith.andi %25, %19 : vector<16x1xi1>
    %27 = vector.broadcast %15 : i32 to vector<16x1xi32>
    %28 = arith.addi %17, %27 : vector<16x1xi32>
    %29 = arith.select %26, %28, %17 : vector<16x1xi1>, vector<16x1xi32>
    %c0_i32_15 = arith.constant 0 : i32
    %30 = vector.broadcast %c0_i32_15 : i32 to vector<16x1xi32>
    %31 = arith.cmpi ne, %29, %30 : vector<16x1xi32>
    %cst_16 = arith.constant 0.000000e+00 : f32
    %32 = vector.broadcast %cst_16 : f32 to vector<1x32xf32>
    %33 = vector.extract_strided_slice %12 {offsets = [0, 0], sizes = [15, 32], strides = [1, 1]} : vector<16x32xf32> to vector<15x32xf32>
    %34 = tpu.concatenate %32, %33 in 0 : vector<1x32xf32>, vector<15x32xf32> -> vector<16x32xf32>
    %cst_17 = arith.constant 0.000000e+00 : f32
    %35 = vector.shape_cast %31 : vector<16x1xi1> to vector<16x1xi1>
    %36 = vector.broadcast %35 : vector<16x1xi1> to vector<16x32xi1>
    %37 = vector.broadcast %cst_17 : f32 to vector<16x32xf32>
    %38 = arith.select %36, %34, %37 : vector<16x32xi1>, vector<16x32xf32>
    %c7_i32 = arith.constant 7 : i32
    %39 = vector.broadcast %c7_i32 : i32 to vector<16x1xi32>
    %40 = arith.cmpi ne, %29, %39 : vector<16x1xi32>
    %cst_18 = arith.constant 0.000000e+00 : f32
    %41 = vector.broadcast %cst_18 : f32 to vector<1x32xf32>
    %42 = vector.extract_strided_slice %12 {offsets = [1, 0], sizes = [15, 32], strides = [1, 1]} : vector<16x32xf32> to vector<15x32xf32>
    %43 = tpu.concatenate %42, %41 in 0 : vector<15x32xf32>, vector<1x32xf32> -> vector<16x32xf32>
    %cst_19 = arith.constant 0.000000e+00 : f32
    %44 = vector.shape_cast %40 : vector<16x1xi1> to vector<16x1xi1>
    %45 = vector.broadcast %44 : vector<16x1xi1> to vector<16x32xi1>
    %46 = vector.broadcast %cst_19 : f32 to vector<16x32xf32>
    %47 = arith.select %45, %43, %46 : vector<16x32xi1>, vector<16x32xf32>
    %c0_20 = arith.constant 0 : index
    %c0_21 = arith.constant 0 : index
    %c0_22 = arith.constant 0 : index
    %48 = vector.load %arg4[%c0_20, %c0_21, %c0_22] : memref<3x32x32xf32, #tpu.memory_space<vmem>>, vector<1x32x32xf32>
    %49 = vector.shape_cast %48 : vector<1x32x32xf32> to vector<32x32xf32>
    %cst_23 = arith.constant dense<0.000000e+00> : vector<16x32xf32>
    %50 = tpu.matmul %38, %49, %cst_23 {dimension_numbers = #tpu.dot_dimension_numbers<[1], [0], [0], [1], [0, 0, 1, 1], [], []>} : vector<16x32xf32>, vector<32x32xf32>, vector<16x32xf32> -> vector<16x32xf32>
    %c1_24 = arith.constant 1 : index
    %c0_25 = arith.constant 0 : index
    %c0_26 = arith.constant 0 : index
    %51 = vector.load %arg4[%c1_24, %c0_25, %c0_26] : memref<3x32x32xf32, #tpu.memory_space<vmem>>, vector<1x32x32xf32>
    %52 = vector.shape_cast %51 : vector<1x32x32xf32> to vector<32x32xf32>
    %cst_27 = arith.constant dense<0.000000e+00> : vector<16x32xf32>
    %53 = tpu.matmul %12, %52, %cst_27 {dimension_numbers = #tpu.dot_dimension_numbers<[1], [0], [0], [1], [0, 0, 1, 1], [], []>} : vector<16x32xf32>, vector<32x32xf32>, vector<16x32xf32> -> vector<16x32xf32>
    %54 = arith.addf %50, %53 : vector<16x32xf32>
    %c2 = arith.constant 2 : index
    %c0_28 = arith.constant 0 : index
    %c0_29 = arith.constant 0 : index
    %55 = vector.load %arg4[%c2, %c0_28, %c0_29] : memref<3x32x32xf32, #tpu.memory_space<vmem>>, vector<1x32x32xf32>
    %56 = vector.shape_cast %55 : vector<1x32x32xf32> to vector<32x32xf32>
    %cst_30 = arith.constant dense<0.000000e+00> : vector<16x32xf32>
    %57 = tpu.matmul %47, %56, %cst_30 {dimension_numbers = #tpu.dot_dimension_numbers<[1], [0], [0], [1], [0, 0, 1, 1], [], []>} : vector<16x32xf32>, vector<32x32xf32>, vector<16x32xf32> -> vector<16x32xf32>
    %58 = arith.addf %54, %57 : vector<16x32xf32>
    %c0_31 = arith.constant 0 : index
    %c0_32 = arith.constant 0 : index
    %59 = vector.load %arg5[%c0_31, %c0_32] : memref<1x32xf32, #tpu.memory_space<vmem>>, vector<1x32xf32>
    %60 = vector.broadcast %59 : vector<1x32xf32> to vector<16x32xf32>
    %61 = arith.addf %58, %60 : vector<16x32xf32>
    %cst_33 = arith.constant 0.000000e+00 : f32
    %62 = vector.broadcast %cst_33 : f32 to vector<16x32xf32>
    %63 = arith.maximumf %61, %62 : vector<16x32xf32>
    %c0_34 = arith.constant 0 : index
    %c0_35 = arith.constant 0 : index
    %64 = vector.load %arg13[%c0_34, %c0_35] : memref<32x32xf32, #tpu.memory_space<vmem>>, vector<16x32xf32>
    tpu.vector_store %arg13[%c0_34, %c0_35], %63 {strides = array<i32>} : memref<32x32xf32, #tpu.memory_space<vmem>>, vector<16x32xf32>,
    %c0_36 = arith.constant 0 : index
    %c0_37 = arith.constant 0 : index
    %65 = tpu.strided_load %arg13[%c0_36, %c0_37] {strides = array<i32: 2, 1>} : memref<32x32xf32, #tpu.memory_space<vmem>>, vector<8x32xf32>
    %c1_38 = arith.constant 1 : index
    %c0_39 = arith.constant 0 : index
    %66 = tpu.strided_load %arg13[%c1_38, %c0_39] {strides = array<i32: 2, 1>} : memref<32x32xf32, #tpu.memory_space<vmem>>, vector<8x32xf32>
    %67 = arith.maximumf %65, %66 : vector<8x32xf32>
    %68 = tpu.iota {dimensions = array<i32: 0>} : vector<8x1xi32>
    %c4_i32 = arith.constant 4 : i32
    %c0_i32_40 = arith.constant 0 : i32
    %69 = arith.cmpi eq, %c4_i32, %c0_i32_40 : i32
    %c1_i32_41 = arith.constant 1 : i32
    %70 = arith.select %69, %c1_i32_41, %c4_i32 : i32
    %71 = vector.broadcast %70 : i32 to vector<8x1xi32>
    %72 = arith.remsi %68, %71 : vector<8x1xi32>
    %c0_i32_42 = arith.constant 0 : i32
    %73 = vector.broadcast %c0_i32_42 : i32 to vector<8x1xi32>
    %74 = arith.cmpi ne, %72, %73 : vector<8x1xi32>
    %c0_i32_43 = arith.constant 0 : i32
    %75 = vector.broadcast %c0_i32_43 : i32 to vector<8x1xi32>
    %76 = arith.cmpi slt, %72, %75 : vector<8x1xi32>
    %c0_i32_44 = arith.constant 0 : i32
    %77 = arith.cmpi slt, %70, %c0_i32_44 : i32
    %78 = vector.broadcast %77 : i1 to vector<8x1xi1>
    %79 = vector.broadcast %78 : vector<8x1xi1> to vector<8x1xi1>
    %80 = arith.xori %76, %79 : vector<8x1xi1>
    %81 = arith.andi %80, %74 : vector<8x1xi1>
    %82 = vector.broadcast %70 : i32 to vector<8x1xi32>
    %83 = arith.addi %72, %82 : vector<8x1xi32>
    %84 = arith.select %81, %83, %72 : vector<8x1xi1>, vector<8x1xi32>
    %c0_i32_45 = arith.constant 0 : i32
    %85 = vector.broadcast %c0_i32_45 : i32 to vector<8x1xi32>
    %86 = arith.cmpi ne, %84, %85 : vector<8x1xi32>
    %cst_46 = arith.constant 0.000000e+00 : f32
    %87 = vector.broadcast %cst_46 : f32 to vector<1x32xf32>
    %88 = vector.extract_strided_slice %67 {offsets = [0, 0], sizes = [7, 32], strides = [1, 1]} : vector<8x32xf32> to vector<7x32xf32>
    %89 = tpu.concatenate %87, %88 in 0 : vector<1x32xf32>, vector<7x32xf32> -> vector<8x32xf32>
    %cst_47 = arith.constant 0.000000e+00 : f32
    %90 = vector.shape_cast %86 : vector<8x1xi1> to vector<8x1xi1>
    %91 = vector.broadcast %90 : vector<8x1xi1> to vector<8x32xi1>
    %92 = vector.broadcast %cst_47 : f32 to vector<8x32xf32>
    %93 = arith.select %91, %89, %92 : vector<8x32xi1>, vector<8x32xf32>
    %c3_i32 = arith.constant 3 : i32
    %94 = vector.broadcast %c3_i32 : i32 to vector<8x1xi32>
    %95 = arith.cmpi ne, %84, %94 : vector<8x1xi32>
    %cst_48 = arith.constant 0.000000e+00 : f32
    %96 = vector.broadcast %cst_48 : f32 to vector<1x32xf32>
    %97 = vector.extract_strided_slice %67 {offsets = [1, 0], sizes = [7, 32], strides = [1, 1]} : vector<8x32xf32> to vector<7x32xf32>
    %98 = tpu.concatenate %97, %96 in 0 : vector<7x32xf32>, vector<1x32xf32> -> vector<8x32xf32>
    %cst_49 = arith.constant 0.000000e+00 : f32
    %99 = vector.shape_cast %95 : vector<8x1xi1> to vector<8x1xi1>
    %100 = vector.broadcast %99 : vector<8x1xi1> to vector<8x32xi1>
    %101 = vector.broadcast %cst_49 : f32 to vector<8x32xf32>
    %102 = arith.select %100, %98, %101 : vector<8x32xi1>, vector<8x32xf32>
    %c0_50 = arith.constant 0 : index
    %c0_51 = arith.constant 0 : index
    %c0_52 = arith.constant 0 : index
    %103 = vector.load %arg6[%c0_50, %c0_51, %c0_52] : memref<3x32x32xf32, #tpu.memory_space<vmem>>, vector<1x32x32xf32>
    %104 = vector.shape_cast %103 : vector<1x32x32xf32> to vector<32x32xf32>
    %cst_53 = arith.constant dense<0.000000e+00> : vector<8x32xf32>
    %105 = tpu.matmul %93, %104, %cst_53 {dimension_numbers = #tpu.dot_dimension_numbers<[1], [0], [0], [1], [0, 0, 1, 1], [], []>} : vector<8x32xf32>, vector<32x32xf32>, vector<8x32xf32> -> vector<8x32xf32>
    %c1_54 = arith.constant 1 : index
    %c0_55 = arith.constant 0 : index
    %c0_56 = arith.constant 0 : index
    %106 = vector.load %arg6[%c1_54, %c0_55, %c0_56] : memref<3x32x32xf32, #tpu.memory_space<vmem>>, vector<1x32x32xf32>
    %107 = vector.shape_cast %106 : vector<1x32x32xf32> to vector<32x32xf32>
    %cst_57 = arith.constant dense<0.000000e+00> : vector<8x32xf32>
    %108 = tpu.matmul %67, %107, %cst_57 {dimension_numbers = #tpu.dot_dimension_numbers<[1], [0], [0], [1], [0, 0, 1, 1], [], []>} : vector<8x32xf32>, vector<32x32xf32>, vector<8x32xf32> -> vector<8x32xf32>
    %109 = arith.addf %105, %108 : vector<8x32xf32>
    %c2_58 = arith.constant 2 : index
    %c0_59 = arith.constant 0 : index
    %c0_60 = arith.constant 0 : index
    %110 = vector.load %arg6[%c2_58, %c0_59, %c0_60] : memref<3x32x32xf32, #tpu.memory_space<vmem>>, vector<1x32x32xf32>
    %111 = vector.shape_cast %110 : vector<1x32x32xf32> to vector<32x32xf32>
    %cst_61 = arith.constant dense<0.000000e+00> : vector<8x32xf32>
    %112 = tpu.matmul %102, %111, %cst_61 {dimension_numbers = #tpu.dot_dimension_numbers<[1], [0], [0], [1], [0, 0, 1, 1], [], []>} : vector<8x32xf32>, vector<32x32xf32>, vector<8x32xf32> -> vector<8x32xf32>
    %113 = arith.addf %109, %112 : vector<8x32xf32>
    %c0_62 = arith.constant 0 : index
    %c0_63 = arith.constant 0 : index
    %114 = vector.load %arg7[%c0_62, %c0_63] : memref<1x32xf32, #tpu.memory_space<vmem>>, vector<1x32xf32>
    %115 = vector.broadcast %114 : vector<1x32xf32> to vector<8x32xf32>
    %116 = arith.addf %113, %115 : vector<8x32xf32>
    %cst_64 = arith.constant 0.000000e+00 : f32
    %117 = vector.broadcast %cst_64 : f32 to vector<8x32xf32>
    %118 = arith.maximumf %116, %117 : vector<8x32xf32>
    %c0_65 = arith.constant 0 : index
    %c0_66 = arith.constant 0 : index
    %119 = vector.load %arg13[%c0_65, %c0_66] : memref<32x32xf32, #tpu.memory_space<vmem>>, vector<8x32xf32>
    tpu.vector_store %arg13[%c0_65, %c0_66], %118 {strides = array<i32>} : memref<32x32xf32, #tpu.memory_space<vmem>>, vector<8x32xf32>,
    %c0_67 = arith.constant 0 : index
    %c0_68 = arith.constant 0 : index
    %120 = tpu.strided_load %arg13[%c0_67, %c0_68] {strides = array<i32: 2, 1>} : memref<32x32xf32, #tpu.memory_space<vmem>>, vector<4x32xf32>
    %c1_69 = arith.constant 1 : index
    %c0_70 = arith.constant 0 : index
    %121 = tpu.strided_load %arg13[%c1_69, %c0_70] {strides = array<i32: 2, 1>} : memref<32x32xf32, #tpu.memory_space<vmem>>, vector<4x32xf32>
    %122 = arith.maximumf %120, %121 : vector<4x32xf32>
    %123 = tpu.iota {dimensions = array<i32: 0>} : vector<2x4xi32>
    %124 = tpu.iota {dimensions = array<i32: 1>} : vector<2x4xi32>
    %c2_i32 = arith.constant 2 : i32
    %125 = vector.broadcast %c2_i32 : i32 to vector<2x4xi32>
    %126 = arith.muli %123, %125 : vector<2x4xi32>
    %127 = arith.cmpi sge, %124, %126 : vector<2x4xi32>
    %c1_i32_71 = arith.constant 1 : i32
    %128 = vector.broadcast %c1_i32_71 : i32 to vector<2x4xi32>
    %129 = arith.addi %123, %128 : vector<2x4xi32>
    %c2_i32_72 = arith.constant 2 : i32
    %130 = vector.broadcast %c2_i32_72 : i32 to vector<2x4xi32>
    %131 = arith.muli %129, %130 : vector<2x4xi32>
    %132 = arith.cmpi slt, %124, %131 : vector<2x4xi32>
    %133 = arith.andi %127, %132 : vector<2x4xi1>
    %cst_73 = arith.constant 5.000000e-01 : f32
    %cst_74 = arith.constant 0.000000e+00 : f32
    %134 = vector.broadcast %cst_73 : f32 to vector<2x4xf32>
    %135 = vector.broadcast %cst_74 : f32 to vector<2x4xf32>
    %136 = arith.select %133, %134, %135 : vector<2x4xi1>, vector<2x4xf32>
    %cst_75 = arith.constant dense<0.000000e+00> : vector<2x32xf32>
    %137 = tpu.matmul %136, %122, %cst_75 {dimension_numbers = #tpu.dot_dimension_numbers<[1], [0], [0], [1], [0, 0, 1, 1], [], []>} : vector<2x4xf32>, vector<4x32xf32>, vector<2x32xf32> -> vector<2x32xf32>
    %c0_76 = arith.constant 0 : index
    %c0_77 = arith.constant 0 : index
    %138 = vector.load %arg8[%c0_76, %c0_77] : memref<32x32xf32, #tpu.memory_space<vmem>>, vector<32x32xf32>
    %cst_78 = arith.constant dense<0.000000e+00> : vector<2x32xf32>
    %139 = tpu.matmul %137, %138, %cst_78 {dimension_numbers = #tpu.dot_dimension_numbers<[1], [0], [0], [1], [0, 0, 1, 1], [], []>} : vector<2x32xf32>, vector<32x32xf32>, vector<2x32xf32> -> vector<2x32xf32>
    %c0_79 = arith.constant 0 : index
    %c0_80 = arith.constant 0 : index
    %140 = vector.load %arg9[%c0_79, %c0_80] : memref<1x32xf32, #tpu.memory_space<vmem>>, vector<1x32xf32>
    %141 = vector.broadcast %140 : vector<1x32xf32> to vector<2x32xf32>
    %142 = arith.addf %139, %141 : vector<2x32xf32>
    %cst_81 = arith.constant 0.000000e+00 : f32
    %143 = vector.broadcast %cst_81 : f32 to vector<2x32xf32>
    %144 = arith.maximumf %142, %143 : vector<2x32xf32>
    %c0_82 = arith.constant 0 : index
    %c0_83 = arith.constant 0 : index
    %145 = vector.load %arg10[%c0_82, %c0_83] : memref<32x128xf32, #tpu.memory_space<vmem>>, vector<32x128xf32>
    %cst_84 = arith.constant dense<0.000000e+00> : vector<2x128xf32>
    %146 = tpu.matmul %144, %145, %cst_84 {dimension_numbers = #tpu.dot_dimension_numbers<[1], [0], [0], [1], [0, 0, 1, 1], [], []>} : vector<2x32xf32>, vector<32x128xf32>, vector<2x128xf32> -> vector<2x128xf32>
    %c0_85 = arith.constant 0 : index
    %c0_86 = arith.constant 0 : index
    %147 = vector.load %arg11[%c0_85, %c0_86] : memref<1x128xf32, #tpu.memory_space<vmem>>, vector<1x128xf32>
    %148 = vector.broadcast %147 : vector<1x128xf32> to vector<2x128xf32>
    %149 = arith.addf %146, %148 : vector<2x128xf32>
    %c0_87 = arith.constant 0 : index
    %c0_88 = arith.constant 0 : index
    %c0_89 = arith.constant 0 : index
    %150 = vector.load %arg12[%c0_87, %c0_88, %c0_89] : memref<1x2x128xf32, #tpu.memory_space<vmem>>, vector<1x2x128xf32>
    %151 = vector.shape_cast %150 : vector<1x2x128xf32> to vector<2x128xf32>
    %152 = vector.shape_cast %149 : vector<2x128xf32> to vector<1x2x128xf32>
    tpu.vector_store %arg12[%c0_87, %c0_88, %c0_89], %152 {strides = array<i32>} : memref<1x2x128xf32, #tpu.memory_space<vmem>>, vector<1x2x128xf32>,
    return
  }
  func.func @transform_0(%arg0: i32) -> (i32, i32, i32) {
    %c0_i32 = arith.constant 0 : i32
    %c0_i32_0 = arith.constant 0 : i32
    %c0_i32_1 = arith.constant 0 : i32
    return %arg0, %c0_i32, %c0_i32_0 : i32, i32, i32
  }
  func.func @transform_1(%arg0: i32) -> (i32, i32) {
    %c0_i32 = arith.constant 0 : i32
    %c0_i32_0 = arith.constant 0 : i32
    %c0_i32_1 = arith.constant 0 : i32
    return %c0_i32, %c0_i32_0 : i32, i32
  }
  func.func @transform_2(%arg0: i32) -> (i32, i32) {
    %c0_i32 = arith.constant 0 : i32
    %c0_i32_0 = arith.constant 0 : i32
    %c0_i32_1 = arith.constant 0 : i32
    return %c0_i32, %c0_i32_0 : i32, i32
  }
  func.func @transform_3(%arg0: i32) -> (i32, i32, i32) {
    %c0_i32 = arith.constant 0 : i32
    %c0_i32_0 = arith.constant 0 : i32
    %c0_i32_1 = arith.constant 0 : i32
    %c0_i32_2 = arith.constant 0 : i32
    return %c0_i32, %c0_i32_0, %c0_i32_1 : i32, i32, i32
  }
  func.func @transform_4(%arg0: i32) -> (i32, i32) {
    %c0_i32 = arith.constant 0 : i32
    %c0_i32_0 = arith.constant 0 : i32
    %c0_i32_1 = arith.constant 0 : i32
    return %c0_i32, %c0_i32_0 : i32, i32
  }
  func.func @transform_5(%arg0: i32) -> (i32, i32, i32) {
    %c0_i32 = arith.constant 0 : i32
    %c0_i32_0 = arith.constant 0 : i32
    %c0_i32_1 = arith.constant 0 : i32
    %c0_i32_2 = arith.constant 0 : i32
    return %c0_i32, %c0_i32_0, %c0_i32_1 : i32, i32, i32
  }
  func.func @transform_6(%arg0: i32) -> (i32, i32) {
    %c0_i32 = arith.constant 0 : i32
    %c0_i32_0 = arith.constant 0 : i32
    %c0_i32_1 = arith.constant 0 : i32
    return %c0_i32, %c0_i32_0 : i32, i32
  }
  func.func @transform_7(%arg0: i32) -> (i32, i32) {
    %c0_i32 = arith.constant 0 : i32
    %c0_i32_0 = arith.constant 0 : i32
    %c0_i32_1 = arith.constant 0 : i32
    return %c0_i32, %c0_i32_0 : i32, i32
  }
  func.func @transform_8(%arg0: i32) -> (i32, i32) {
    %c0_i32 = arith.constant 0 : i32
    %c0_i32_0 = arith.constant 0 : i32
    %c0_i32_1 = arith.constant 0 : i32
    return %c0_i32, %c0_i32_0 : i32, i32
  }
  func.func @transform_9(%arg0: i32) -> (i32, i32) {
    %c0_i32 = arith.constant 0 : i32
    %c0_i32_0 = arith.constant 0 : i32
    %c0_i32_1 = arith.constant 0 : i32
    return %c0_i32, %c0_i32_0 : i32, i32
  }
  func.func @transform_10(%arg0: i32) -> (i32, i32) {
    %c0_i32 = arith.constant 0 : i32
    %c0_i32_0 = arith.constant 0 : i32
    %c0_i32_1 = arith.constant 0 : i32
    return %c0_i32, %c0_i32_0 : i32, i32
  }
  func.func @transform_11(%arg0: i32) -> (i32, i32, i32) {
    %c0_i32 = arith.constant 0 : i32
    %c0_i32_0 = arith.constant 0 : i32
    %c0_i32_1 = arith.constant 0 : i32
    return %arg0, %c0_i32, %c0_i32_0 : i32, i32, i32
  }
}

</mosaic_0001>

<bundles_post_ra>
// kernel: tpu_custom_call.1
= control target key start
LH: loop header
LB: loop body
LE: loop exit
PB: predicated region body
PF: predicated region fallthrough
CT: control target
= control target key end

     0   :  { %s2449_s0 = inlined_call_operand.vmem [shape: f32[2,32,28], index: 0, kind: input, shape index: {}]   ;;  %s2450_s1 = inlined_call_operand.vmem [shape: f32[28,32], index: 1, kind: input, shape index: {}]   ;;  %s2451_s2 = inlined_call_operand.vmem [shape: f32[1,32], index: 2, kind: input, shape index: {}]   ;;  %s2452_s3 = inlined_call_operand.vmem [shape: f32[3,32,32], index: 3, kind: input, shape index: {}]   ;;  %s2453_s4 = inlined_call_operand.vmem [shape: f32[1,32], index: 4, kind: input, shape index: {}]   ;;  %s2454_s5 = inlined_call_operand.hbm [shape: f32[3,32,32], index: 5, kind: input, shape index: {}]   ;;  %s2455_s6 = inlined_call_operand.vmem [shape: f32[1,32], index: 6, kind: input, shape index: {}]   ;;  %s2456_s7 = inlined_call_operand.hbm [shape: f32[32,32], index: 7, kind: input, shape index: {}]   ;;  %s2457_s8 = inlined_call_operand.vmem [shape: f32[1,32], index: 8, kind: input, shape index: {}]   ;;  %s2458_s9 = inlined_call_operand.hbm [shape: f32[32,128], index: 9, kind: input, shape index: {}]   ;;  %s2459_s10 = inlined_call_operand.vmem [shape: f32[1,128], index: 10, kind: input, shape index: {}]   ;;  %s2460_s11 = inlined_call_operand.hbm [shape: f32[2,2,128], index: 11, kind: output, shape index: {}]  }
   0x1   :  { %2471 = sst [smem:[#allocation19_spill]] %s2460_s11 }
   0x2   :  { %16 = vsyncpa [#allocation4], 0 }
   0x3   :  { %17 = vsyncpa [#allocation7], 0 }
   0x4   :  { %18 = vsyncpa [#allocation5], 0 }
   0x5   :  { %20 = vsyncpa [#allocation5 + $0x1], 0  ;;  %s2108_s17 = smov 0   ;;  %s2110_s18 = smov 0  }
   0x6   :  { %s2112_s19 = smov 0   ;;  %s2114_s20 = smov 0  }
   0x7 LB: > { %2472 = sst [smem:[#allocation13_spill]] %s2024_s17  ;;  %s2129_s21 = sadd.s32 4294967295, %s2036_s20   ;;  %s2036_s20 = sphi %s2114_s20, %s2496_s20   ;;  %s2032_s19 = sphi %s2112_s19, %s2498_s19   ;;  %s2028_s18 = sphi %s2110_s18, %s2500_s18   ;;  %s2024_s17 = sphi %s2108_s17, %s2499_s17  }
   0x8   : > { %2473 = sst [smem:[#allocation14_spill]] %s2032_s19  ;;  %s1529_s22 = sadd.s32 4294967294, %s2036_s20  }
   0x9   : > { %2474 = sst [smem:[#allocation15_spill]] %s2036_s20  ;;  %s2133_s23 = sadd.s32 1, %s2036_s20  }
   0xa   : > { %2475 = sst [smem:[#allocation16_spill]] %s2133_s23  ;;  %s269_s24 = sadd.s32 1, %s2032_s19 }
   0xb   : > { %s266_s25 = ssub.s32 %s2036_s20, %s2133_s23  ;;  %p279_p0 = scmp.ne.s32.totalorder %s2032_s19, %s2028_s18 }
   0xc   : > { %p267_p1 = scmp.eq.s32.totalorder %s266_s25, 0  ;;  %p280_p2 = scmp.eq.s32.totalorder %s2129_s21, 1 }
   0xd   : > { %p285_p3 = scmp.ne.s32.totalorder %s2028_s18, %s2024_s17  ;;  %p286_p4 = scmp.eq.s32.totalorder %s1529_s22, 1 }
   0xe   : > { %s2144_s26 = scalar_select %p267_p1, %s2032_s19, %s269_s24  }
   0xf   : > { %p2146_p5 = por %p280_p2, %p279_p0  ;;  %p2150_p6 = por %p286_p4, %p285_p3 }
  0x10   : > { %2476 = sst [smem:[#allocation17_spill]] %s2144_s26  ;;  %p1530_p7 = scmp.ge.s32.totalorder %s2036_s20, 1 }
  0x11   : > { %s2477_s27 = scalar_select %p2146_p5, 1, 0 }
  0x12   : > { %s2478_s28 = scalar_select %p2150_p6, 1, 0 }
  0x13   : > { %p293_p8 = scmp.lt.s32.totalorder %s2036_s20, 3  ;;  %p2464_p9 = scmp.eq.s32.totalorder %s2129_s21, 0 }
  0x14   : > { %2479 = sst [smem:[#allocation18_spill]] %s2478_s28  ;;  %s2038_s30 = smov [#allocation6]  }
  0x15   : > { %p2157_p10 = pnand %p1530_p7, %p293_p8  ;;  %s333_s12 = sshll.u32 %s2038_s30, 4  ;;  %s2163_s12 = int_to_ptr.vmem [resolvable:$true] %s333_s12 }
  0x16   : > { %s2039_s14 = smov [#allocation3]   ;;  %s2040_s16 = smov [#allocation8]  }
  0x17   : > { %s2480_s29 = scalar_select %p2157_p10, 1, 0 }
  0x18   : > { %p1820_p11 = pneg %p2157_p10  ;;  %s317_s15 = sshll.u32 %s2039_s14, 4  ;;  %s2171_s15 = int_to_ptr.vmem [resolvable:$true] %s317_s15 }
  0x19   : > { %s2173_s22 = sshll.u32 %s2040_s16, 4  ;;  %s1882_s26 = scalar_lea.hbm %s2456_s7, 512  ;;  %s350_s22 = int_to_ptr.vmem [resolvable:$true] %s2173_s22 }
  0x1a   : > { %p2167_p12 = pnand %p2464_p9, %p1820_p11  ;;  %p1883_p13 = scmp.ne.s32.totalorder %s2456_s7, %s1882_s26 }
  0x1b   : > { %p1889_p3 = scmp.lt.u32.totalorder %s1882_s26, %s2456_s7 }
  0x1c   : > { %p2183_p0 = pneg %p2167_p12 }
  0x1e   : > { %p1885_p1 = pnand %p2183_p0, %p1883_p13 }
  0x20   : > { %p1886_p2 = pneg %p1885_p1 }
  0x22   : > { %p1891_p4 = pnand %p1889_p3, %p1886_p2 }
  0x24   : > { %1894 = shalt.err (!%p1891_p4)
}
  0x25   : > { %s1895_s19 = scalar_lea.vmem %s2163_s12, 512  ;;  %p1903_p9 = scmp.lt.s32.totalorder %s2163_s12, %s2163_s12 }
  0x26   : > { %p1896_p7 = scmp.ne.s32.totalorder %s2163_s12, %s1895_s19  ;;  %p1904_p6 = scmp.lt.s32.totalorder %s1895_s19, %s1895_s19 }
  0x28   : > { %p1898_p8 = pnand %p1896_p7, %p2183_p0  ;;  %p1905_p13 = por %p1904_p6, %p1903_p9 }
  0x2a   : > { %p1899_p11 = pneg %p1898_p8 }
  0x2c   : > { %p1906_p1 = pnand %p1905_p13, %p1899_p11 }
  0x2e   : > { %1909 = shalt.err (!%p1906_p1)
}
  0x2f   : > { %s2041_s24 = smov 128   ;;  %s2042_s26 = smov 8  }
  0x30   : > { %1826 = dma.hbm_to_vmem [thread:$0]  (!%p2167_p12), %s2456_s7, 512, %s2163_s12, [#allocation7], %s2041_s24, %s2041_s24, %s2042_s26  }
  0x31   : > { %s1910_s19 = scalar_lea.hbm %s2454_s5, 1536 }
  0x32   : > { %p1911_p6 = scmp.ne.s32.totalorder %s2454_s5, %s1910_s19  ;;  %p1917_p3 = scmp.lt.u32.totalorder %s1910_s19, %s2454_s5 }
  0x34   : > { %p1913_p9 = pnand %p1911_p6, %p2183_p0 }
  0x36   : > { %p1914_p2 = pneg %p1913_p9 }
  0x38   : > { %p1919_p4 = pnand %p1917_p3, %p1914_p2 }
  0x3a   : > { %1922 = shalt.err (!%p1919_p4)
}
  0x3b   : > { %s1923_s12 = scalar_lea.vmem %s2171_s15, 1536  ;;  %p1931_p13 = scmp.lt.s32.totalorder %s2171_s15, %s2171_s15 }
  0x3c   : > { %p1924_p7 = scmp.ne.s32.totalorder %s2171_s15, %s1923_s12  ;;  %p1932_p1 = scmp.lt.s32.totalorder %s1923_s12, %s1923_s12 }
  0x3e   : > { %p1926_p8 = pnand %p1924_p7, %p2183_p0  ;;  %p1933_p6 = por %p1932_p1, %p1931_p13 }
  0x40   : > { %p1927_p11 = pneg %p1926_p8 }
  0x42   : > { %p1934_p9 = pnand %p1933_p6, %p1927_p11 }
  0x44   : > { %1937 = shalt.err (!%p1934_p9)
}
  0x45   : > { %1823 = dma.hbm_to_vmem [thread:$0]  (!%p2167_p12), %s2454_s5, 1536, %s2171_s15, [#allocation4], %s2041_s24, %s2041_s24, %s2042_s26  }
  0x46   : > { %s1938_s25 = scalar_lea.hbm %s2458_s9, 512 }
  0x47   : > { %p1939_p2 = scmp.ne.s32.totalorder %s2458_s9, %s1938_s25  ;;  %p1945_p7 = scmp.lt.u32.totalorder %s1938_s25, %s2458_s9 }
  0x49   : > { %p1941_p3 = pnand %p1939_p2, %p2183_p0 }
  0x4b   : > { %p1942_p4 = pneg %p1941_p3 }
  0x4d   : > { %p1947_p8 = pnand %p1945_p7, %p1942_p4 }
  0x4f   : > { %1950 = shalt.err (!%p1947_p8)
}
  0x50   : > { %s1951_s12 = scalar_lea.vmem %s350_s22, 512  ;;  %p1959_p6 = scmp.lt.s32.totalorder %s350_s22, %s350_s22 }
  0x51   : > { %p1952_p11 = scmp.ne.s32.totalorder %s350_s22, %s1951_s12  ;;  %p1960_p9 = scmp.lt.s32.totalorder %s1951_s12, %s1951_s12 }
  0x53   : > { %p1954_p13 = pnand %p1952_p11, %p2183_p0  ;;  %p1961_p5 = por %p1960_p9, %p1959_p6 }
  0x55   : > { %p1955_p1 = pneg %p1954_p13 }
  0x57   : > { %p1962_p10 = pnand %p1961_p5, %p1955_p1 }
  0x59   : > { %1965 = shalt.err (!%p1962_p10)
}
  0x5a   : > { %1829 = dma.hbm_to_vmem [thread:$0]  (!%p2167_p12), %s2458_s9, 512, %s350_s22, [#allocation7], %s2041_s24, %s2041_s24, %s2042_s26  }
  0x5b   : > { %p2483_p2 = scmp.ne.s32.totalorder %s2480_s29, 0 }
  0x5c   : > { %p2484_p0 = scmp.eq.s32.totalorder (!%p2483_p2), %s2129_s21, 0 }
  0x5d   : > { %376 = sbr.rel (%p2483_p2) target bundleno = 1490 (0x5d2), region = 64 }
  0x64   : > { %2011 = dma.done.wait (%p2484_p0), [#allocation4], 1536   ;;  %p2485_p3 = pmov %p2484_p0 }
  0x65   : > { %p2486_p5 = pmov %p2484_p0 }
  0x66   : > { %2013 = vsyncadd (%p2485_p3), [#allocation4], 4294965760 }
  0x67   : > { %2015 = dma.done.wait (%p2486_p5), [#allocation7], 1024   ;;  %p2487_p10 = pmov %p2484_p0 }
  0x68   : > { %p424_p4 = scmp.lt.s32.totalorder %s2129_s21, 1  ;;  %vm457_vm0 = vcmask 1043456   ;;  %vm444_vm1 = vcmask 228352   ;;  %v433_v0 = vld [vmem:[%s2450_s1] sm:$0xff]  ;;  %v434_v1 = vld [vmem:[%s2450_s1 + $0x8] sm:$0xff]  ;;  %v435_v2 = vld [vmem:[%s2450_s1 + $0x10] sm:$0xff]  ;;  %v564_v27 = vlaneseq }
  0x69   : > { %2017 = vsyncadd (%p2487_p10), [#allocation7], 4294966272  ;;  %v1738_v3 = vpack.c.bf16 %v434_v1, %v433_v0  ;;  %v436_v4 = vld [vmem:[%s2450_s1 + $0x18] sm:$0xf]  ;;  %vm2043_vm2 = vmmov 1   ;;  %v1548_v10 = vld [vmem:[%s2452_s3 + $0x20] sm:$0xff] }
  0x6a   : > { %s425_s23 = scalar_select %p424_p4, %s2129_s21, 1  ;;  %v1742_v6 = vpack.c.bf16 %v436_v4, %v435_v2  ;;  %vm1743_vm3 = vmpackc.low %vm457_vm0, %vm2043_vm2  ;;  %v1549_v11 = vld [vmem:[%s2452_s3 + $0x28] sm:$0xff]  ;;  %v1550_v13 = vld [vmem:[%s2452_s3 + $0x30] sm:$0xff]  ;;  %vm550_vm4 = vcmask 261120   ;;  %v2311_v33 = vshrl.u32 %v564_v27, 7  ;;  %vm595_vm5 = vcmask 1040384  }
  0x6b   : > { %1739 = vmatprep.subr.bf16.mxu0 %v1738_v3  ;;  %v1748_v12 = vpack.c.bf16 %v1549_v11, %v1548_v10  ;;  %v1551_v14 = vld [vmem:[%s2452_s3 + $0x38] sm:$0xff]  ;;  %v623_v16 = vld [vmem:[%s2452_s3] sm:$0xff]  ;;  %v624_v17 = vld [vmem:[%s2452_s3 + $0x8] sm:$0xff]  ;;  %vm610_vm7 = vcmask 1046528   ;;  %vm2045_vm11 = vmmov 0   ;;  %vm1178_vm2 = vcmask 31744  }
  0x6c   : > { %s1577_s13 = sshll.u32 %s425_s23, 5  ;;  %1741 = vmatpush3.bf16.msra.mxu0 %v1738_v3  ;;  %v1752_v15 = vpack.c.bf16 %v1551_v14, %v1550_v13  ;;  %v1756_v18 = vpack.c.bf16 %v624_v17, %v623_v16  ;;  %v1542_v19 = vld [vmem:[%s2451_s2] ss:$0 sm:$0xff]  ;;  %v571_v34 = vand.u32 7, %v2311_v33  ;;  %v625_v38 = vld [vmem:[%s2452_s3 + $0x10] sm:$0xff]  ;;  %v626_v39 = vld [vmem:[%s2452_s3 + $0x18] sm:$0xff] }
  0x6d   : > { %s428_s24 = scalar_lea.vmem %s2449_s0, %s1577_s13  ;;  %1744 = vmatprep.subr.msk.bf16.mxu0 %vm1743_vm3, %v1742_v6  ;;  %1749 = vmatprep.subr.bf16.mxu1 %v1748_v12  ;;  %v566_v42 = vadd.s32 8, %v2311_v33  ;;  %v1760_v47 = vpack.c.bf16 %v626_v39, %v625_v38  ;;  %v1556_v49 = vld [vmem:[%s2452_s3 + $0x40] sm:$0xff]  ;;  %v1557_v50 = vld [vmem:[%s2452_s3 + $0x48] sm:$0xff]  ;;  %v1558_v56 = vld [vmem:[%s2452_s3 + $0x50] sm:$0xff]  ;;  %s421_s14 = sand.u32 1, %s2028_s18  }
  0x6e   : > { %v429_v5 = vld [vmem:[%s428_s24] sm:$0xff]  ;;  %v430_v7 = vld [vmem:[%s428_s24 + $0x8] sm:$0xff]  ;;  %v431_v8 = vld [vmem:[%s428_s24 + $0x10] sm:$0xff]  ;;  %1751 = vmatpush3.bf16.msra.mxu1 %v1748_v12  ;;  %vm2323_vm6 = vcmp.ne.s32.totalorder %v571_v34, 0  ;;  %v1764_v54 = vpack.c.bf16 %v1557_v50, %v1556_v49  ;;  %vm608_vm9 = vcmp.ne.s32.totalorder %v571_v34, 7  ;;  %v1173_v49 = vadd.s32 1, %v2311_v33 }
  0x6f   : > { %1639 = vmatprep.mubr.msk.f32.mxu0 %vm444_vm1, %v429_v5  ;;  %v432_v9 = vld [vmem:[%s428_s24 + $0x18] sm:$0xff]  ;;  %1753 = vmatprep.subr.bf16.mxu1 %v1752_v15  ;;  %v578_v51 = vand.u32 7, %v566_v42  ;;  %v928_v1 = vld [vmem:[#allocation3 + $0x20] sm:$0xff]  ;;  %v929_v2 = vld [vmem:[#allocation3 + $0x28] sm:$0xff]  ;;  %s1539_s16 = sshll.u32 %s421_s14, 1  ;;  %s1574_s15 = sshll.u32 %s2129_s21, 5 }
  0x70   : > { %1747 = vmatpush3.bf16.msk.msra.mxu0 %vm1743_vm3, %v1742_v6  ;;  %v1559_v57 = vld [vmem:[%s2452_s3 + $0x58] sm:$0xff]  ;;  %v1773_v3 = vpack.c.bf16 %v929_v2, %v928_v1  ;;  %v930_v4 = vld [vmem:[#allocation3 + $0x30] sm:$0xff]  ;;  %v2044_v6 = vmov 0.0|0.0   ;;  %v923_v16 = vld [vmem:[#allocation3] sm:$0xff]  ;;  %s423_s11 = scalar_lea.vmem [#allocation9], %s1539_s16  ;;  %s2490_s29 = sld [smem:[#allocation19_spill]] }
  0x71   : > { %vm592_vm8 = vcmp.ne.s32.totalorder %v578_v51, 0  ;;  %v1768_v60 = vpack.c.bf16 %v1559_v57, %v1558_v56  ;;  %vm609_vm10 = vcmp.ne.s32.totalorder %v578_v51, 7  ;;  %v931_v5 = vld [vmem:[#allocation3 + $0x38] sm:$0xff]  ;;  %1772 = vmatprep.subr.bf16.mxu0 %v2044_v6  ;;  %v924_v17 = vld [vmem:[#allocation3 + $0x8] sm:$0xff]  ;;  %s1439_s23 = sshll.u32 %s423_s11, 4  ;;  %s1426_s26 = scalar_lea.sflag [#allocation5], %s421_s14  ;;  %s2409_s23 = int_to_ptr.vmem [resolvable:$true] %s1439_s23 }
  0x72   : > { %1755 = vmatpush3.bf16.msra.mxu1 %v1752_v15  ;;  %v1081_v34 = vld [vmem:[#allocation3 + $0x58] sm:$0xff]  ;;  %v1256_v56 = vld [vmem:[#allocation6 + $0x8] sm:$0xff]  ;;  %s1966_s17 = scalar_lea.vmem %s2409_s23, 32  ;;  %p2491_p7 = scmp.ne.s32.totalorder %s2477_s27, 0 }
  0x73   : > { %1640 = vmatmul.mubr.msk.f32.vlgmr.msra.gmra.mrb[0].mxu0 %vm444_vm1, %v430_v7  ;;  %1757 = vmatprep.subr.bf16.mxu1 %v1756_v18  ;;  %v2046_v7 = vmov 0.0   ;;  %p1967_p12 = scmp.ne.s32.totalorder %s2409_s23, %s1966_s17  ;;  %s2047_s21 = smov [#allocation9]  }
  0x74   : > { %1642 = vmatprep.mubr.msk.f32.mxu0 %vm444_vm1, %v431_v8  ;;  %1774 = vmatpush3.bf16.msra.mxu0 %v1773_v3  ;;  %v1776_v8 = vpack.c.bf16 %v931_v5, %v930_v4  ;;  %v1342_v4 = vld [vmem:[#allocation8 + $0x10] sm:$0xff]  ;;  %v1343_v5 = vld [vmem:[#allocation8 + $0x18] sm:$0xff]  ;;  %s1970_s20 = sshll.u32 %s2047_s21, 4  ;;  %s1971_s20 = int_to_ptr.vmem [resolvable:$false] %s1970_s20 }
  0x75   : > { %1775 = vmatprep.subr.bf16.mxu0 %v2044_v6  ;;  %p1968_p8 = pnand %p1967_p12, %p2491_p7  ;;  %s1972_s28 = scalar_lea.vmem %s1971_s20, 64 }
  0x76   : > { %s2407_s24 = scalar_lea.hbm %s2490_s29, %s1574_s15  ;;  %p1973_p13 = scmp.lt.s32.totalorder %s2409_s23, %s1971_s20 }
  0x77   : > { %1643 = vmatmul.mubr.msk.f32.gmra.mrb[2].mxu0 %vm444_vm1, %v432_v9  ;;  %v1562_v9 = vld [vmem:[%s2453_s4] ss:$0 sm:$0xff]  ;;  %p1969_p11 = pneg %p1968_p8  ;;  %p1974_p1 = scmp.lt.s32.totalorder %s1972_s28, %s1966_s17 }
  0x78   : > { %1686 = vmatprep.mubr.msk.f32.mxu0 %vm2045_vm11, %v2046_v7  ;;  %1777 = vmatpush3.bf16.msra.mxu0 %v1776_v8  ;;  %v1800_v8 = vpack.c.bf16 %v1343_v5, %v1342_v4 }
  0x79   : > { %1778 = vmatprep.subr.bf16.mxu0 %v2044_v6  ;;  %p1975_p6 = por %p1974_p1, %p1973_p13 }
  0x7b   : > { %p1976_p9 = pnand %p1975_p6, %p1969_p11 }
 0x146   : > { %v1641_v20 = vpop.f32.mrb[0].mxu0 }
 0x147   : > { %v533_v21 = vadd.f32 %v1641_v20, %v1542_v19  ;;  %v527_v22 = vpop.f32.mrb[1].mxu0  ;;  %v1779_v20 = vpack.c.bf16 %v924_v17, %v923_v16 }
 0x148   : > { %v528_v23 = vadd.f32 %v1542_v19, %v527_v22  ;;  %v925_v22 = vld [vmem:[#allocation3 + $0x10] sm:$0xff] }
 0x149   : > { %v547_v24 = vmax.f32 %v533_v21, 0.0 }
 0x14a   : > { %v546_v25 = vmax.f32 %v528_v23, 0.0  ;;  %v1644_v26 = vpop.f32.mrb[2].mxu0  ;;  %v926_v23 = vld [vmem:[#allocation3 + $0x18] sm:$0xff] }
 0x14b   : > { %552 = vst.msk [vmem:[#allocation2 + $0x8] sm:$0xff] %vm550_vm4, %v547_v24  ;;  %v543_v28 = vadd.f32 %v1644_v26, %v1542_v19  ;;  %v537_v29 = vpop.f32.mrb[3].mxu0  ;;  %v900_v24 = vand.u32 3, %v2311_v33  ;;  %v1782_v26 = vpack.c.bf16 %v926_v23, %v925_v22 }
 0x14c   : > { %551 = vst.msk [vmem:[#allocation2] sm:$0xff] %vm550_vm4, %v546_v25  ;;  %v538_v30 = vadd.f32 %v1542_v19, %v537_v29  ;;  %v1079_v29 = vld [vmem:[#allocation3 + $0x48] sm:$0xff] }
 0x14d   : > { %v549_v31 = vmax.f32 %v543_v28, 0.0  ;;  %v1078_v28 = vld [vmem:[#allocation3 + $0x40] sm:$0xff]  ;;  %vm908_vm12 = vcmp.ne.s32.totalorder %v900_v24, 0  ;;  %vm916_vm13 = vcmp.ne.s32.totalorder %v900_v24, 3 }
 0x14e   : > { %v548_v32 = vmax.f32 %v538_v30, 0.0 }
 0x14f   : > { %554 = vst.msk [vmem:[#allocation2 + $0x18] sm:$0xff] %vm550_vm4, %v549_v31  ;;  %v1785_v31 = vpack.c.bf16 %v1079_v29, %v1078_v28 }
 0x150   : > { %553 = vst.msk [vmem:[#allocation2 + $0x10] sm:$0xff] %vm550_vm4, %v548_v32  ;;  %v1080_v32 = vld [vmem:[#allocation3 + $0x50] sm:$0xff] }
 0x153   : > { %v555_v35 = vld [vmem:[#allocation2] ss:$2 sm:$0xff]  ;;  %v559_v36 = vld [vmem:[#allocation2 + $0x1] ss:$2 sm:$0xff] }
 0x154   : > { %v562_v37 = vmax.f32 %v555_v35, %v559_v36 }
 0x156   : > { %1653 = vmatprep.mubr.msk.f32.mxu1 %vm550_vm4, %v562_v37  ;;  %v596_v41 = vrot.slane %v562_v37, 7  ;;  %v611_v55 = vrot.slane %v562_v37, 1  ;;  %v1788_v37 = vpack.c.bf16 %v1081_v34, %v1080_v32 }
 0x157   : > { %v557_v43 = vld [vmem:[#allocation2 + $0x10] ss:$2 sm:$0xff]  ;;  %v561_v44 = vld [vmem:[#allocation2 + $0x11] ss:$2 sm:$0xff] }
 0x158   : > { %v563_v45 = vmax.f32 %v557_v43, %v561_v44  ;;  %v601_v46 = vsel %vm595_vm5, 0.0, %v596_v41 }
 0x159   : > { %v606_v48 = vsel %vm2323_vm6, %v601_v46, 0.0  ;;  %v1566_v46 = vld [vmem:[%s2455_s6] ss:$0 sm:$0xff] }
 0x15a   : > { %1654 = vmatmul.mubr.msk.f32.vlgmr.msra.gmra.mrb[0].mxu1 %vm550_vm4, %v563_v45  ;;  %v597_v52 = vrot.slane %v563_v45, 7  ;;  %v612_v53 = vrot.slane %v563_v45, 1 }
 0x15b   : > { %1759 = vmatpush3.bf16.msra.mxu1 %v1756_v18  ;;  %1664 = vmatprep.mubr.msk.f32.mxu1 %vm550_vm4, %v606_v48 }
 0x15c   : > { %1761 = vmatprep.subr.bf16.mxu1 %v1760_v47  ;;  %v598_v58 = vsel %vm595_vm5, %v596_v41, %v597_v52  ;;  %v613_v59 = vsel %vm610_vm7, %v611_v55, %v612_v53  ;;  %v616_v63 = vsel %vm610_vm7, %v612_v53, 0.0  ;;  %v1170_v52 = vand.u32 127, %v564_v27  ;;  %v1255_v55 = vld [vmem:[#allocation6] sm:$0xff] }
 0x15d   : > { %v607_v61 = vsel %vm592_vm8, %v598_v58, 0.0  ;;  %v621_v62 = vsel %vm608_vm9, %v613_v59, 0.0  ;;  %v622_v0 = vsel %vm609_vm10, %v616_v63, 0.0  ;;  %v1171_v53 = vmul.u32 2, %v2311_v33  ;;  %v1258_v63 = vld [vmem:[#allocation6 + $0x18] sm:$0xff]  ;;  %v1340_v33 = vld [vmem:[#allocation8] sm:$0xff] }
 0x15f   : > { %1763 = vmatpush3.bf16.msra.mxu1 %v1760_v47  ;;  %vm1172_vm14 = vcmp.ge.s32.totalorder %v1170_v52, %v1171_v53 }
 0x160   : > { %1765 = vmatprep.subr.bf16.mxu1 %v1764_v54 }
 0x162   : > { %1665 = vmatmul.mubr.msk.f32.vlgmr.msra.gmra.mrb[0].mxu1 %vm550_vm4, %v607_v61  ;;  %v1791_v61 = vpack.c.bf16 %v1256_v56, %v1255_v55 }
 0x163   : > { %1767 = vmatpush3.bf16.msra.mxu1 %v1764_v54  ;;  %1675 = vmatprep.mubr.msk.f32.mxu1 %vm550_vm4, %v621_v62  ;;  %v1174_v54 = vmul.u32 2, %v1173_v49  ;;  %v1257_v62 = vld [vmem:[#allocation6 + $0x10] sm:$0xff] }
 0x164   : > { %1769 = vmatprep.subr.bf16.mxu1 %v1768_v60  ;;  %v1794_v27 = vpack.c.bf16 %v1258_v63, %v1257_v62 }
 0x165   : > { %vm1175_vm15 = vcmp.lt.s32.totalorder %v1170_v52, %v1174_v54 }
 0x166   : > { %vm1176_vm1 = vmand %vm1172_vm14, %vm1175_vm15 }
 0x167   : > { %1771 = vmatpush3.bf16.msra.mxu1 %v1768_v60  ;;  %v1177_v60 = vsel %vm1176_vm1, 0.5, %v2046_v7 }
 0x168   : > { %1711 = vmatprep.subr.mxu1 %v2046_v7 }
 0x16a   : > { %1676 = vmatmul.mubr.msk.f32.vlgmr.msra.gmra.mrb[0].mxu1 %vm550_vm4, %v622_v0  ;;  %v1341_v0 = vld [vmem:[#allocation8 + $0x8] sm:$0xff] }
 0x16b   : > { %1713 = vmatprep.mubr.msk.f32.mxu1 %vm2045_vm11, %v2046_v7  ;;  %v1797_v1 = vpack.c.bf16 %v1341_v0, %v1340_v33 }
 0x23d   : > { %v1677_v10 = vpop.f32.mrb[0].mxu1 }
 0x23e   : > { %v888_v11 = vadd.f32 %v1677_v10, %v1562_v9  ;;  %v869_v12 = vpop.f32.mrb[1].mxu1 }
 0x23f   : > { %v887_v13 = vadd.f32 %v1562_v9, %v869_v12 }
 0x240   : > { %v890_v14 = vmax.f32 %v888_v11, 0.0 }
 0x241   : > { %v889_v15 = vmax.f32 %v887_v13, 0.0 }
 0x242   : > { %892 = vst.msk [vmem:[#allocation2 + $0x8] sm:$0xff] %vm550_vm4, %v890_v14 }
 0x243   : > { %891 = vst.msk [vmem:[#allocation2] sm:$0xff] %vm550_vm4, %v889_v15 }
 0x24a   : > { %v893_v18 = vld [vmem:[#allocation2] ss:$2 sm:$0xff]  ;;  %v894_v19 = vld [vmem:[#allocation2 + $0x1] ss:$2 sm:$0xff] }
 0x24b   : > { %v895_v21 = vmax.f32 %v893_v18, %v894_v19 }
 0x24d   : > { %1687 = vmatmul.mubr.msk.f32.vlgmr.msra.gmra.mrb[4].mxu0 %vm550_vm4, %v895_v21  ;;  %v910_v25 = vrot.slane %v895_v21, 7  ;;  %v917_v36 = vrot.slane %v895_v21, 1 }
 0x24e   : > { %1780 = vmatpush3.bf16.msra.mxu0 %v1779_v20  ;;  %1697 = vmatprep.mubr.msk.f32.mxu0 %vm2045_vm11, %v2046_v7 }
 0x24f   : > { %1781 = vmatprep.subr.bf16.mxu0 %v2044_v6  ;;  %v912_v30 = vsel %vm595_vm5, 0.0, %v910_v25  ;;  %v919_v38 = vsel %vm610_vm7, %v917_v36, 0.0 }
 0x250   : > { %v915_v35 = vsel %vm908_vm12, %v912_v30, 0.0  ;;  %v922_v39 = vsel %vm916_vm13, %v919_v38, 0.0 }
 0x252   : > { %1783 = vmatpush3.bf16.msra.mxu0 %v1782_v26 }
 0x253   : > { %1784 = vmatprep.subr.bf16.mxu0 %v2044_v6 }
 0x255   : > { %1698 = vmatmul.mubr.msk.f32.vlgmr.msra.gmra.mrb[6].mxu0 %vm550_vm4, %v915_v35 }
 0x256   : > { %1786 = vmatpush3.bf16.msra.mxu0 %v1785_v31  ;;  %1708 = vmatprep.mubr.msk.f32.mxu0 %vm2045_vm11, %v2046_v7 }
 0x257   : > { %1787 = vmatprep.subr.bf16.mxu0 %v2044_v6 }
 0x25a   : > { %1789 = vmatpush3.bf16.msra.mxu0 %v1788_v37 }
 0x25b   : > { %1796 = vmatprep.subr.bf16.mxu0 %v2044_v6 }
 0x25d   : > { %1709 = vmatmul.mubr.msk.f32.vlgmr.msra.gmra.mrb[8].mxu0 %vm550_vm4, %v922_v39 }
 0x25e   : > { %1735 = vmatprep.mubr.msk.f32.mxu0 %vm2045_vm11, %v2046_v7  ;;  %1798 = vmatpush3.bf16.msra.mxu0 %v1797_v1 }
 0x25f   : > { %1799 = vmatprep.subr.bf16.mxu0 %v2044_v6 }
 0x262   : > { %1801 = vmatpush3.bf16.msra.mxu0 %v1800_v8 }
 0x320   : > { %v1000_v40 = vpop.f32.mrb[4].mxu0 }
 0x321   : > { %v1688_v41 = vpop.f32.mrb[5].mxu0 }
 0x328   : > { %v1073_v42 = vpop.f32.mrb[6].mxu0 }
 0x329   : > { %v1074_v43 = vadd.f32 %v1073_v42, %v1000_v40  ;;  %v1699_v44 = vpop.f32.mrb[7].mxu0 }
 0x330   : > { %v1151_v45 = vpop.f32.mrb[8].mxu0 }
 0x331   : > { %v1155_v47 = vadd.f32 %v1151_v45, %v1074_v43  ;;  %v1710_v48 = vpop.f32.mrb[9].mxu0 }
 0x333   : > { %v1163_v50 = vadd.f32 %v1566_v46, %v1155_v47 }
 0x335   : > { %v1164_v51 = vmax.f32 %v1163_v50, 0.0 }
 0x337   : > { %1165 = vst.msk [vmem:[#allocation2] sm:$0xff] %vm550_vm4, %v1164_v51 }
 0x33e   : > { %v1166_v57 = vld [vmem:[#allocation2] ss:$2 sm:$0xf]  ;;  %v1167_v58 = vld [vmem:[#allocation2 + $0x1] ss:$2 sm:$0xf] }
 0x33f   : > { %v1168_v59 = vmax.f32 %v1166_v57, %v1167_v58 }
 0x341   : > { %1712 = vmatpush3.msk.msra.mxu1 %vm457_vm0, %v1168_v59 }
 0x342   : > { %1714 = vmatmul.mubr.msk.f32.vlgmr.msra.gmra.mrb[2].mxu1 %vm1178_vm2, %v1177_v60  ;;  %1790 = vmatprep.subr.bf16.mxu1 %v2044_v6 }
 0x343   : > { %1792 = vmatpush3.bf16.msra.mxu1 %v1791_v61  ;;  %1724 = vmatprep.mubr.msk.f32.mxu1 %vm2045_vm11, %v2046_v7  ;;  %v1569_v7 = vld [vmem:[%s2457_s8] ss:$0 sm:$0xff] }
 0x344   : > { %1793 = vmatprep.subr.bf16.mxu1 %v2044_v6  ;;  %v1571_v6 = vld [vmem:[%s2459_s10] ss:$0 sm:$0xff] }
 0x347   : > { %1795 = vmatpush3.bf16.msra.mxu1 %v1794_v27 }
 0x415   : > { %v1251_v2 = vpop.f32.mrb[2].mxu1 }
 0x416   : > { %v1715_v3 = vpop.f32.mrb[3].mxu1  ;;  %1725 = vmatmul.mubr.msk.f32.vlgmr.msra.gmra.mrb[4].mxu1 %vm550_vm4, %v1251_v2 }
 0x4e9   : > { %v1335_v9 = vpop.f32.mrb[4].mxu1 }
 0x4ea   : > { %v1336_v10 = vadd.f32 %v1569_v7, %v1335_v9  ;;  %v1726_v11 = vpop.f32.mrb[5].mxu1 }
 0x4ec   : > { %v1339_v12 = vmax.f32 %v1336_v10, 0.0 }
 0x4ee   : > { %1736 = vmatmul.mubr.msk.f32.vlgmr.msra.gmra.mrb[10].mxu0 %vm550_vm4, %v1339_v12 }
 0x5c1   : > { %v1420_v13 = vpop.f32.mrb[10].mxu0 }
 0x5c2   : > { %v1421_v14 = vadd.f32 %v1571_v6, %v1420_v13  ;;  %v1737_v15 = vpop.f32.mrb[11].mxu0 }
 0x5c4   : > { %1424 = vst [vmem:[%s423_s11] sm:$0x3] %v1421_v14 }
 0x5c5   : > { %1979 = shalt.err (!%p1976_p9)
}
 0x5c6   : > { %s1980_s25 = scalar_lea.hbm %s2407_s24, 32  ;;  %s1984_s16 = scalar_lea.hbm %s2490_s29, 64 }
 0x5c7   : > { %p1981_p2 = scmp.ne.s32.totalorder %s2407_s24, %s1980_s25  ;;  %p1985_p5 = scmp.lt.u32.totalorder %s2407_s24, %s2490_s29 }
 0x5c8   : > { %p1986_p10 = scmp.lt.u32.totalorder %s1984_s16, %s1980_s25  ;;  %p1988_p12 = scmp.lt.u32.totalorder %s1980_s25, %s2407_s24 }
 0x5c9   : > { %p1982_p0 = pnand %p1981_p2, %p2491_p7 }
 0x5ca   : > { %p1987_p4 = por %p1986_p10, %p1985_p5 }
 0x5cb   : > { %p1983_p3 = pneg %p1982_p0 }
 0x5cc   : > { %p1989_p8 = por %p1988_p12, %p1987_p4 }
 0x5ce   : > { %p1990_p11 = pnand %p1989_p8, %p1983_p3 }
 0x5d0   : > { %1993 = shalt.err (!%p1990_p11)
}
 0x5d1   : > { %1818 = dma.vmem_to_hbm [thread:$0]  (%p2491_p7), %s2409_s23, 32, %s2407_s24, %s1426_s26  }
 0x5d2 PF: > { %s2492_s15 = sld [smem:[#allocation15_spill]]  ;;  %s2493_s11 = sld [smem:[#allocation13_spill]] }
 0x5d3   : > { %s2494_s13 = sld [smem:[#allocation18_spill]] }
 0x5d8   : > { %p1840_p13 = scmp.ge.s32.totalorder %s2492_s15, 2  ;;  %s1451_s22 = sand.u32 1, %s2493_s11  }
 0x5d9   : > { %p2495_p1 = scmp.ne.s32.totalorder %s2494_s13, 0  ;;  %s1452_s17 = scalar_lea.sflag [#allocation5], %s1451_s22 }
 0x5db   : > { %p1831_p6 = pnand %p1840_p13, %p2495_p1 }
 0x5dd   : > { %2019 = dma.done.wait (!%p1831_p6), %s1452_s17, 32  }
 0x5de   : > { %2021 = vsyncadd (!%p1831_p6), %s1452_s17, 4294967264  ;;  %s2496_s20 = sld [smem:[#allocation16_spill]]  ;;  %s2497_s21 = sld [smem:[#allocation14_spill]] }
 0x5df   : > { %s2498_s19 = sld [smem:[#allocation17_spill]]  ;;  %s2499_s17 = smov %s2028_s18 }
 0x5e4   : > { %p23_p9 = scmp.ge.s32.totalorder %s2496_s20, 4   ;;  %s2500_s18 = smov %s2497_s21 }
 0x5e6   :  { %25 = sbr.rel (!%p23_p9) target bundleno = 7 (0x7), region = 119 }
 0x5ed   :  { %1457 = vsyncpa [#allocation4], 1 }
 0x5ee   :  { %1459 = vsyncpa [#allocation4 + $0x1], 1 }
 0x5ef   :  { %1460 = vsyncpa [#allocation7], 1 }
 0x5f0   :  { %1461 = vsyncpa [#allocation5], 1 }
 0x5f1   :  { %1463 = vsyncpa [#allocation5 + $0x1], 1 }

</bundles_post_ra>
